<compile_context>
chip_gen: v6e
topology: v6e:2x2x1
jax: 0.10.0
libtpu: 0.0.40
codegen_flags: <defaults>
</compile_context>

<pallas_src>
import functools

import jax
import jax.numpy as jnp
from jax import lax
from jax.experimental import pallas as pl
from jax.experimental.pallas import tpu as pltpu


def _softmax_last(z):
    m = jnp.max(z, axis=-1, keepdims=True)
    e = jnp.exp(z - m)
    return e * pl.reciprocal(jnp.sum(e, axis=-1, keepdims=True), approx=False)


def _sigmoid(z):
    # exp + reciprocal both live in the EUP slot, keeping VALU slots free.
    return pl.reciprocal(1.0 + jnp.exp(-z), approx=False)


def _ln_over_channels(y, gamma, beta, eps):
    # y: (c, HW); LayerNorm over the channel axis (per pixel / per lane
    # column), matching nn.LayerNorm applied to channels-last data.
    # Single-pass variance: E[y^2] - mean^2.
    mean = jnp.mean(y, axis=0, keepdims=True)
    var = jnp.maximum(jnp.mean(y * y, axis=0, keepdims=True) - mean * mean, 0.0)
    return (y - mean) * lax.rsqrt(var + eps) * gamma + beta


def _efb_kernel(x_ref, w_ref, ln_ref, o_ref, *, half_c, nb, eps):
    f32 = jnp.float32
    h = half_c
    cdt = x_ref.dtype                    # MXU operand dtype (f32 or bf16)

    # ---- parameter slabs: sliced & cast ONCE per grid step (hoisted) -------
    w = w_ref[...]                                      # (11h, C) f32
    w_proj = w[: 5 * h, :].astype(cdt)                  # fused nd1/q/k/v/out2a
    wo2b = w[5 * h: 6 * h, :h].astype(cdt)              # out_2 | attn half
    wo1 = w[6 * h: 7 * h, :h].astype(cdt)               # out_1
    woa = w[7 * h: 9 * h, :h].astype(cdt)               # out   | y1 half
    wob = w[9 * h: 11 * h, :h].astype(cdt)              # out   | y2 half

    ln = ln_ref[...]                                    # (C, 6) f32
    g2, b2 = ln[:h, 0:1], ln[:h, 1:2]
    g1, b1 = ln[:h, 2:3], ln[:h, 3:4]
    go, bo = ln[:, 4:5], ln[:, 5:6]

    for i in range(nb):                                 # static, unrolled
        x = x_ref[i]                                    # (C, HW), input dtype
        xc = x.astype(cdt)

        # Single MXU push: [nd1*s ; q*s ; k ; v ; wo2a@x2] = W_proj @ x.
        proj = jnp.dot(w_proj, xc, preferred_element_type=f32)   # (5h, HW)
        nd1 = proj[0 * h:1 * h]        # already scaled by 1/(H*W*half_c)
        q = proj[1 * h:2 * h]          # already scaled
        k = proj[2 * h:3 * h]
        v = proj[3 * h:4 * h]
        y2a = proj[4 * h:5 * h]        # out_2 weight (x2 columns) applied to x2

        # Channel attention on x2 (scale already folded into q).
        p2 = _softmax_last(lax.dot_general(
            q.astype(cdt), k.astype(cdt), (((1,), (1,)), ((), ())),
            preferred_element_type=f32))
        attn_x2 = jnp.dot(p2.astype(cdt), v.astype(cdt),
                          preferred_element_type=f32)             # (h, HW)

        # out_2: Linear(C->h) on cat(x2, attn_x2), folded as y2a + wo2b@attn.
        y2 = y2a + jnp.dot(wo2b, attn_x2.astype(cdt),
                           preferred_element_type=f32)
        y2 = _ln_over_channels(y2, g2, b2, eps)                   # f32
        y2c = y2.astype(cdt)

        # Correlation gate on x1 (nd1 already carries the scale).
        p1 = _softmax_last(lax.dot_general(
            nd1.astype(cdt), y2c, (((1,), (1,)), ((), ())),
            preferred_element_type=f32))
        corr = _sigmoid(jnp.dot(p1.astype(cdt), y2c,
                                preferred_element_type=f32))
        x1g = x[:h].astype(f32) * (corr + 1.0)                    # x1*corr + x1

        # out_1: Linear(h->h) + LayerNorm.
        y1 = jnp.dot(wo1, x1g.astype(cdt), preferred_element_type=f32)
        y1 = _ln_over_channels(y1, g1, b1, eps)

        # out: Linear(C->C) on cat(y1, y2) (split weight), LN, ReLU, residual.
        yo = (jnp.dot(woa, y1.astype(cdt), preferred_element_type=f32)
              + jnp.dot(wob, y2c, preferred_element_type=f32))
        yo = jnp.maximum(_ln_over_channels(yo, go, bo, eps), 0.0)

        o_ref[i] = (yo + x.astype(f32)).astype(o_ref.dtype)


def _derive_launch(N, C, HW, half_c, io_itemsize):
    """Pick batch-elements-per-grid-step and a shape-derived VMEM limit."""
    try:
        vmem_cap = int(pltpu.get_tpu_info().vmem_capacity_bytes)
    except Exception:
        vmem_cap = 64 * 1024 * 1024            # conservative (v7x per-core)
    budget = max(vmem_cap - 16 * 1024 * 1024, 16 * 1024 * 1024)

    def need(nb):
        io = 4 * nb * C * HW * io_itemsize     # in + out, double-buffered
        live = 18 * nb * half_c * HW * 4       # live f32 intermediates (est.)
        return io + live + (2 << 20)           # params + slack

    nb = 1
    for cand in range(1, N + 1):
        if N % cand:
            continue
        if need(cand) > budget:
            continue
        if N >= 2 and N // cand < 2:
            continue                           # keep >=2 steps for 2 TCs (v7x)
        if cand * C * HW * io_itemsize > (8 << 20):
            continue                           # keep single DMA reasonable
        nb = cand
    # TODO(synk): for very large H*W where even nb=1 exceeds the VMEM budget,
    # tile the spatial axis (two-pass logits accumulation) instead of relying
    # on a larger vmem limit.
    vmem_limit = int(min(budget, max(2 * need(nb), 32 * 1024 * 1024)))
    return nb, vmem_limit


def efb_forward(x_nchw, params, *, eps=1e-5):
    """EFB forward.  x_nchw: (N, C, H, W); dtype (f32 or bf16) is used for HBM
    I/O and MXU operands, accumulation / LN / softmax / sigmoid stay f32."""
    N, C, H, W = x_nchw.shape
    h = C // 2
    HW = H * W
    scale = 1.0 / float(H * W * h)
    f32 = jnp.float32

    x_flat = x_nchw.reshape(N, C, HW)          # free contiguous view of NCHW
    io_dtype = x_flat.dtype

    # ---- consolidate all Linear weights into one (11h, C) slab -------------
    w1 = jnp.asarray(params["ln_1"], f32)                  # (h, h)
    w2 = jnp.asarray(params["ln_2"], f32)                  # (3h, h)
    wo2 = jnp.asarray(params["out_2_lin"], f32)            # (h, C)
    wo1 = jnp.asarray(params["out_1_lin"], f32)            # (h, h)
    wo = jnp.asarray(params["out_lin"], f32)               # (C, C)
    zh = jnp.zeros((h, h), f32)

    def pad_cols(a):                                       # pad to C columns
        return jnp.concatenate(
            [a, jnp.zeros((a.shape[0], C - a.shape[1]), f32)], axis=1)

    w_slab = jnp.concatenate([
        jnp.concatenate([w1 * scale, zh], axis=1),         # nd1 (scale folded)
        jnp.concatenate([zh, w2[:h] * scale], axis=1),     # q   (scale folded)
        jnp.concatenate([zh, w2[h:2 * h]], axis=1),        # k
        jnp.concatenate([zh, w2[2 * h:]], axis=1),         # v
        jnp.concatenate([zh, wo2[:, :h]], axis=1),         # out_2 | x2 half
        pad_cols(wo2[:, h:]),                              # out_2 | attn half
        pad_cols(wo1),                                     # out_1
        pad_cols(wo[:, :h]),                               # out   | y1 half
        pad_cols(wo[:, h:]),                               # out   | y2 half
    ], axis=0)                                             # (11h, C) f32

    # ---- consolidate LayerNorm params into one (C, 6) slab -----------------
    def pad_vec(vv):
        vv = jnp.asarray(vv, f32).reshape(-1)
        return jnp.pad(vv, (0, C - vv.shape[0]))

    ln_slab = jnp.stack(
        [pad_vec(params["out_2_ln_g"]), pad_vec(params["out_2_ln_b"]),
         pad_vec(params["out_1_ln_g"]), pad_vec(params["out_1_ln_b"]),
         jnp.asarray(params["out_ln_g"], f32),
         jnp.asarray(params["out_ln_b"], f32)], axis=1)    # (C, 6) f32

    nb, vmem_limit = _derive_launch(N, C, HW, h, x_flat.dtype.itemsize)
    steps = N // nb

    kernel = functools.partial(_efb_kernel, half_c=h, nb=nb, eps=eps)

    flops = int(N * HW * 40 * h * h)
    transcendentals = int(N * (2 * h * h + 2 * h * HW + 3 * HW))
    slab_bytes = int((w_slab.size + ln_slab.size) * 4)
    cost = pl.CostEstimate(
        flops=flops,
        transcendentals=transcendentals,
        bytes_accessed=int(2 * N * C * HW * x_flat.dtype.itemsize + slab_bytes))

    out_flat = pl.pallas_call(
        kernel,
        out_shape=jax.ShapeDtypeStruct((N, C, HW), io_dtype),
        grid_spec=pltpu.PrefetchScalarGridSpec(
            num_scalar_prefetch=0,
            grid=(steps,),
            in_specs=[pl.BlockSpec((nb, C, HW), lambda b: (b, 0, 0)),
                      pl.BlockSpec(w_slab.shape, lambda b: (0, 0)),
                      pl.BlockSpec(ln_slab.shape, lambda b: (0, 0))],
            out_specs=pl.BlockSpec((nb, C, HW), lambda b: (b, 0, 0)),
        ),
        compiler_params=pltpu.CompilerParams(
            dimension_semantics=("parallel",),     # split batch over TCs (v7x)
            vmem_limit_bytes=vmem_limit,
        ),
        cost_estimate=cost,
    )(x_flat, w_slab, ln_slab)

    return out_flat.reshape(N, C, H, W)


def efb_reference(x, params, eps=1e-5):
    """Pure-JAX f32 reference, mirroring the PyTorch forward exactly."""
    N, C, H, W = x.shape
    half_c = C // 2
    HW = H * W
    scale = 1.0 / float(H * W * half_c)

    def lin(w, t):   # per-pixel Linear on channel-major (N, in, P) -> (N, out, P)
        return jnp.einsum("oi,nip->nop", w, t)

    def ln(t, g, b):  # LayerNorm over channel axis
        mean = t.mean(axis=1, keepdims=True)
        var = ((t - mean) ** 2).mean(axis=1, keepdims=True)
        return (t - mean) / jnp.sqrt(var + eps) * g[None, :, None] + b[None, :, None]

    xf = x.reshape(N, C, HW)
    x1, x2 = xf[:, :half_c], xf[:, half_c:]
    nd1 = lin(params["ln_1"], x1)
    nd2 = lin(params["ln_2"], x2)
    q, k, v = nd2[:, :half_c], nd2[:, half_c:2 * half_c], nd2[:, 2 * half_c:]
    attn = jax.nn.softmax(jnp.einsum("ncp,ndp->ncd", q, k) * scale, axis=-1)
    attn_x2 = jnp.einsum("ncd,ndp->ncp", attn, v)
    y2 = lin(params["out_2_lin"], jnp.concatenate([x2, attn_x2], axis=1))
    y2 = ln(y2, params["out_2_ln_g"], params["out_2_ln_b"])
    attn1 = jax.nn.softmax(jnp.einsum("ncp,ndp->ncd", nd1, y2) * scale, axis=-1)
    corr = jax.nn.sigmoid(jnp.einsum("ncd,ndp->ncp", attn1, y2))
    x1g = x1 * corr + x1
    y1 = ln(lin(params["out_1_lin"], x1g), params["out_1_ln_g"], params["out_1_ln_b"])
    merge = jnp.concatenate([y1, y2], axis=1)
    yo = ln(lin(params["out_lin"], merge), params["out_ln_g"], params["out_ln_b"])
    yo = jnp.maximum(yo, 0.0)
    return (yo + xf).reshape(N, C, H, W)


if __name__ == "__main__":
    key = jax.random.PRNGKey(0)
    keys = jax.random.split(key, 12)

    # half_c = 8 -> channel split / weight row blocks are sublane-aligned (f32).
    N, C, H, W = 2, 16, 16, 16
    half_c = C // 2

    x = jax.random.normal(keys[0], (N, C, H, W), dtype=jnp.float32)
    params = {
        "ln_1": jax.random.normal(keys[1], (half_c, half_c), jnp.float32) * 0.1,
        "ln_2": jax.random.normal(keys[2], (3 * half_c, half_c), jnp.float32) * 0.1,
        "out_2_lin": jax.random.normal(keys[3], (half_c, C), jnp.float32) * 0.1,
        "out_2_ln_g": 1.0 + 0.1 * jax.random.normal(keys[4], (half_c,), jnp.float32),
        "out_2_ln_b": 0.1 * jax.random.normal(keys[5], (half_c,), jnp.float32),
        "out_1_lin": jax.random.normal(keys[6], (half_c, half_c), jnp.float32) * 0.1,
        "out_1_ln_g": 1.0 + 0.1 * jax.random.normal(keys[7], (half_c,), jnp.float32),
        "out_1_ln_b": 0.1 * jax.random.normal(keys[8], (half_c,), jnp.float32),
        "out_lin": jax.random.normal(keys[9], (C, C), jnp.float32) * 0.1,
        "out_ln_g": 1.0 + 0.1 * jax.random.normal(keys[10], (C,), jnp.float32),
        "out_ln_b": 0.1 * jax.random.normal(keys[11], (C,), jnp.float32),
    }

    ref = efb_reference(x, params)

    # f32 I/O path: tight tolerance vs reference.
    out = jax.block_until_ready(efb_forward(x, params))
    assert out.shape == (N, C, H, W)
    err32 = float(jnp.max(jnp.abs(out - ref)))
    assert jnp.allclose(out, ref, atol=2e-4, rtol=2e-4), err32

    # bf16 I/O path: half the HBM traffic, bf16 MXU operands, f32 accumulation.
    out_bf16 = jax.block_until_ready(efb_forward(x.astype(jnp.bfloat16), params))
    assert out_bf16.shape == (N, C, H, W)
    assert out_bf16.dtype == jnp.bfloat16
    err16 = float(jnp.max(jnp.abs(out_bf16.astype(jnp.float32) - ref)))
    assert err16 < 2e-1, err16

    print("KERNEL_OK")
</pallas_src>

<mosaic_0001>
module attributes {stable_mosaic.version = 11 : i64} {
  func.func @_efb_kernel(%arg0: i32, %arg1: memref<1x16x256xf32, #tpu.memory_space<vmem>>, %arg2: memref<88x16xf32, #tpu.memory_space<vmem>>, %arg3: memref<16x6xf32, #tpu.memory_space<vmem>>, %arg4: memref<1x16x256xf32, #tpu.memory_space<vmem>>) attributes {dimension_semantics = [#tpu.dimension_semantics<parallel>], iteration_bounds = array<i64: 2>, scalar_prefetch = 0 : i64, scratch_operands = 0 : i64, tpu.core_type = #tpu.core_type<tc>, window_params = [{transform_indices = @transform_0, window_bounds = array<i64: 1, 16, 256>}, {pipeline_mode = #tpu.pipeline_mode<synchronous>, transform_indices = @transform_1, window_bounds = array<i64: 88, 16>}, {pipeline_mode = #tpu.pipeline_mode<synchronous>, transform_indices = @transform_2, window_bounds = array<i64: 16, 6>}, {transform_indices = @transform_3, window_bounds = array<i64: 1, 16, 256>}]} {
    %c0 = arith.constant 0 : index
    %c0_0 = arith.constant 0 : index
    %0 = vector.load %arg2[%c0, %c0_0] : memref<88x16xf32, #tpu.memory_space<vmem>>, vector<88x16xf32>
    %1 = vector.extract_strided_slice %0 {offsets = [0, 0], sizes = [40, 16], strides = [1, 1]} : vector<88x16xf32> to vector<40x16xf32>
    %2 = vector.extract_strided_slice %0 {offsets = [40, 0], sizes = [8, 8], strides = [1, 1]} : vector<88x16xf32> to vector<8x8xf32>
    %3 = vector.extract_strided_slice %0 {offsets = [48, 0], sizes = [8, 8], strides = [1, 1]} : vector<88x16xf32> to vector<8x8xf32>
    %4 = vector.extract_strided_slice %0 {offsets = [56, 0], sizes = [16, 8], strides = [1, 1]} : vector<88x16xf32> to vector<16x8xf32>
    %5 = vector.extract_strided_slice %0 {offsets = [72, 0], sizes = [16, 8], strides = [1, 1]} : vector<88x16xf32> to vector<16x8xf32>
    %c0_1 = arith.constant 0 : index
    %c0_2 = arith.constant 0 : index
    %6 = vector.load %arg3[%c0_1, %c0_2] : memref<16x6xf32, #tpu.memory_space<vmem>>, vector<16x6xf32>
    %7 = vector.extract_strided_slice %6 {offsets = [0, 0], sizes = [8, 1], strides = [1, 1]} : vector<16x6xf32> to vector<8x1xf32>
    %8 = vector.extract_strided_slice %6 {offsets = [0, 1], sizes = [8, 1], strides = [1, 1]} : vector<16x6xf32> to vector<8x1xf32>
    %9 = vector.extract_strided_slice %6 {offsets = [0, 2], sizes = [8, 1], strides = [1, 1]} : vector<16x6xf32> to vector<8x1xf32>
    %10 = vector.extract_strided_slice %6 {offsets = [0, 3], sizes = [8, 1], strides = [1, 1]} : vector<16x6xf32> to vector<8x1xf32>
    %11 = vector.extract_strided_slice %6 {offsets = [0, 4], sizes = [16, 1], strides = [1, 1]} : vector<16x6xf32> to vector<16x1xf32>
    %12 = vector.extract_strided_slice %6 {offsets = [0, 5], sizes = [16, 1], strides = [1, 1]} : vector<16x6xf32> to vector<16x1xf32>
    %c0_3 = arith.constant 0 : index
    %c0_4 = arith.constant 0 : index
    %c0_5 = arith.constant 0 : index
    %13 = vector.load %arg1[%c0_3, %c0_4, %c0_5] : memref<1x16x256xf32, #tpu.memory_space<vmem>>, vector<1x16x256xf32>
    %14 = vector.shape_cast %13 : vector<1x16x256xf32> to vector<16x256xf32>
    %cst = arith.constant dense<0.000000e+00> : vector<40x256xf32>
    %15 = tpu.matmul %1, %14, %cst {dimension_numbers = #tpu.dot_dimension_numbers<[1], [0], [0], [1], [0, 0, 1, 1], [], []>} : vector<40x16xf32>, vector<16x256xf32>, vector<40x256xf32> -> vector<40x256xf32>
    %16 = vector.extract_strided_slice %15 {offsets = [0, 0], sizes = [8, 256], strides = [1, 1]} : vector<40x256xf32> to vector<8x256xf32>
    %17 = vector.extract_strided_slice %15 {offsets = [8, 0], sizes = [8, 256], strides = [1, 1]} : vector<40x256xf32> to vector<8x256xf32>
    %18 = vector.extract_strided_slice %15 {offsets = [16, 0], sizes = [8, 256], strides = [1, 1]} : vector<40x256xf32> to vector<8x256xf32>
    %19 = vector.extract_strided_slice %15 {offsets = [24, 0], sizes = [8, 256], strides = [1, 1]} : vector<40x256xf32> to vector<8x256xf32>
    %20 = vector.extract_strided_slice %15 {offsets = [32, 0], sizes = [8, 256], strides = [1, 1]} : vector<40x256xf32> to vector<8x256xf32>
    %cst_6 = arith.constant dense<0.000000e+00> : vector<8x8xf32>
    %21 = tpu.matmul %17, %18, %cst_6 {dimension_numbers = #tpu.dot_dimension_numbers<[1], [1], [0], [0], [0, 0, 1, 0], [], []>} : vector<8x256xf32>, vector<8x256xf32>, vector<8x8xf32> -> vector<8x8xf32>
    %cst_7 = arith.constant dense<0xFF800000> : vector<8xf32>
    %22 = vector.multi_reduction <maximumf>, %21, %cst_7 [1] : vector<8x8xf32> to vector<8xf32>
    %23 = vector.shape_cast %22 : vector<8xf32> to vector<8x1xf32>
    %24 = vector.broadcast %23 : vector<8x1xf32> to vector<8x8xf32>
    %25 = arith.subf %21, %24 : vector<8x8xf32>
    %26 = math.exp %25 : vector<8x8xf32>
    %cst_8 = arith.constant dense<0.000000e+00> : vector<8xf32>
    %27 = vector.multi_reduction <add>, %26, %cst_8 [1] : vector<8x8xf32> to vector<8xf32>
    %28 = vector.shape_cast %27 : vector<8xf32> to vector<8x1xf32>
    %29 = tpu.reciprocal %28 : vector<8x1xf32> -> vector<8x1xf32>
    %30 = vector.broadcast %29 : vector<8x1xf32> to vector<8x8xf32>
    %31 = arith.mulf %26, %30 : vector<8x8xf32>
    %cst_9 = arith.constant dense<0.000000e+00> : vector<8x256xf32>
    %32 = tpu.matmul %31, %19, %cst_9 {dimension_numbers = #tpu.dot_dimension_numbers<[1], [0], [0], [1], [0, 0, 1, 1], [], []>} : vector<8x8xf32>, vector<8x256xf32>, vector<8x256xf32> -> vector<8x256xf32>
    %cst_10 = arith.constant dense<0.000000e+00> : vector<8x256xf32>
    %33 = tpu.matmul %2, %32, %cst_10 {dimension_numbers = #tpu.dot_dimension_numbers<[1], [0], [0], [1], [0, 0, 1, 1], [], []>} : vector<8x8xf32>, vector<8x256xf32>, vector<8x256xf32> -> vector<8x256xf32>
    %34 = arith.addf %20, %33 : vector<8x256xf32>
    %cst_11 = arith.constant dense<0.000000e+00> : vector<256xf32>
    %35 = vector.multi_reduction <add>, %34, %cst_11 [0] : vector<8x256xf32> to vector<256xf32>
    %36 = vector.shape_cast %35 : vector<256xf32> to vector<1x256xf32>
    %cst_12 = arith.constant 8.000000e+00 : f32
    %37 = vector.broadcast %cst_12 : f32 to vector<1x256xf32>
    %38 = arith.divf %36, %37 : vector<1x256xf32>
    %39 = arith.mulf %34, %34 : vector<8x256xf32>
    %cst_13 = arith.constant dense<0.000000e+00> : vector<256xf32>
    %40 = vector.multi_reduction <add>, %39, %cst_13 [0] : vector<8x256xf32> to vector<256xf32>
    %41 = vector.shape_cast %40 : vector<256xf32> to vector<1x256xf32>
    %cst_14 = arith.constant 8.000000e+00 : f32
    %42 = vector.broadcast %cst_14 : f32 to vector<1x256xf32>
    %43 = arith.divf %41, %42 : vector<1x256xf32>
    %44 = arith.mulf %38, %38 : vector<1x256xf32>
    %45 = arith.subf %43, %44 : vector<1x256xf32>
    %cst_15 = arith.constant 0.000000e+00 : f32
    %46 = vector.broadcast %cst_15 : f32 to vector<1x256xf32>
    %47 = arith.maximumf %45, %46 : vector<1x256xf32>
    %48 = vector.broadcast %38 : vector<1x256xf32> to vector<8x256xf32>
    %49 = arith.subf %34, %48 : vector<8x256xf32>
    %cst_16 = arith.constant 9.99999974E-6 : f32
    %50 = vector.broadcast %cst_16 : f32 to vector<1x256xf32>
    %51 = arith.addf %47, %50 : vector<1x256xf32>
    %52 = math.rsqrt %51 : vector<1x256xf32>
    %53 = vector.broadcast %52 : vector<1x256xf32> to vector<8x256xf32>
    %54 = arith.mulf %49, %53 : vector<8x256xf32>
    %55 = vector.broadcast %7 : vector<8x1xf32> to vector<8x256xf32>
    %56 = arith.mulf %54, %55 : vector<8x256xf32>
    %57 = vector.broadcast %8 : vector<8x1xf32> to vector<8x256xf32>
    %58 = arith.addf %56, %57 : vector<8x256xf32>
    %cst_17 = arith.constant dense<0.000000e+00> : vector<8x8xf32>
    %59 = tpu.matmul %16, %58, %cst_17 {dimension_numbers = #tpu.dot_dimension_numbers<[1], [1], [0], [0], [0, 0, 1, 0], [], []>} : vector<8x256xf32>, vector<8x256xf32>, vector<8x8xf32> -> vector<8x8xf32>
    %cst_18 = arith.constant dense<0xFF800000> : vector<8xf32>
    %60 = vector.multi_reduction <maximumf>, %59, %cst_18 [1] : vector<8x8xf32> to vector<8xf32>
    %61 = vector.shape_cast %60 : vector<8xf32> to vector<8x1xf32>
    %62 = vector.broadcast %61 : vector<8x1xf32> to vector<8x8xf32>
    %63 = arith.subf %59, %62 : vector<8x8xf32>
    %64 = math.exp %63 : vector<8x8xf32>
    %cst_19 = arith.constant dense<0.000000e+00> : vector<8xf32>
    %65 = vector.multi_reduction <add>, %64, %cst_19 [1] : vector<8x8xf32> to vector<8xf32>
    %66 = vector.shape_cast %65 : vector<8xf32> to vector<8x1xf32>
    %67 = tpu.reciprocal %66 : vector<8x1xf32> -> vector<8x1xf32>
    %68 = vector.broadcast %67 : vector<8x1xf32> to vector<8x8xf32>
    %69 = arith.mulf %64, %68 : vector<8x8xf32>
    %cst_20 = arith.constant dense<0.000000e+00> : vector<8x256xf32>
    %70 = tpu.matmul %69, %58, %cst_20 {dimension_numbers = #tpu.dot_dimension_numbers<[1], [0], [0], [1], [0, 0, 1, 1], [], []>} : vector<8x8xf32>, vector<8x256xf32>, vector<8x256xf32> -> vector<8x256xf32>
    %cst_21 = arith.constant 0.000000e+00 : f32
    %71 = vector.broadcast %cst_21 : f32 to vector<8x256xf32>
    %72 = arith.subf %71, %70 : vector<8x256xf32>
    %73 = math.exp %72 : vector<8x256xf32>
    %cst_22 = arith.constant 1.000000e+00 : f32
    %74 = vector.broadcast %cst_22 : f32 to vector<8x256xf32>
    %75 = arith.addf %74, %73 : vector<8x256xf32>
    %76 = tpu.reciprocal %75 : vector<8x256xf32> -> vector<8x256xf32>
    %77 = vector.extract_strided_slice %14 {offsets = [0, 0], sizes = [8, 256], strides = [1, 1]} : vector<16x256xf32> to vector<8x256xf32>
    %cst_23 = arith.constant 1.000000e+00 : f32
    %78 = vector.broadcast %cst_23 : f32 to vector<8x256xf32>
    %79 = arith.addf %76, %78 : vector<8x256xf32>
    %80 = arith.mulf %77, %79 : vector<8x256xf32>
    %cst_24 = arith.constant dense<0.000000e+00> : vector<8x256xf32>
    %81 = tpu.matmul %3, %80, %cst_24 {dimension_numbers = #tpu.dot_dimension_numbers<[1], [0], [0], [1], [0, 0, 1, 1], [], []>} : vector<8x8xf32>, vector<8x256xf32>, vector<8x256xf32> -> vector<8x256xf32>
    %cst_25 = arith.constant dense<0.000000e+00> : vector<256xf32>
    %82 = vector.multi_reduction <add>, %81, %cst_25 [0] : vector<8x256xf32> to vector<256xf32>
    %83 = vector.shape_cast %82 : vector<256xf32> to vector<1x256xf32>
    %cst_26 = arith.constant 8.000000e+00 : f32
    %84 = vector.broadcast %cst_26 : f32 to vector<1x256xf32>
    %85 = arith.divf %83, %84 : vector<1x256xf32>
    %86 = arith.mulf %81, %81 : vector<8x256xf32>
    %cst_27 = arith.constant dense<0.000000e+00> : vector<256xf32>
    %87 = vector.multi_reduction <add>, %86, %cst_27 [0] : vector<8x256xf32> to vector<256xf32>
    %88 = vector.shape_cast %87 : vector<256xf32> to vector<1x256xf32>
    %cst_28 = arith.constant 8.000000e+00 : f32
    %89 = vector.broadcast %cst_28 : f32 to vector<1x256xf32>
    %90 = arith.divf %88, %89 : vector<1x256xf32>
    %91 = arith.mulf %85, %85 : vector<1x256xf32>
    %92 = arith.subf %90, %91 : vector<1x256xf32>
    %cst_29 = arith.constant 0.000000e+00 : f32
    %93 = vector.broadcast %cst_29 : f32 to vector<1x256xf32>
    %94 = arith.maximumf %92, %93 : vector<1x256xf32>
    %95 = vector.broadcast %85 : vector<1x256xf32> to vector<8x256xf32>
    %96 = arith.subf %81, %95 : vector<8x256xf32>
    %cst_30 = arith.constant 9.99999974E-6 : f32
    %97 = vector.broadcast %cst_30 : f32 to vector<1x256xf32>
    %98 = arith.addf %94, %97 : vector<1x256xf32>
    %99 = math.rsqrt %98 : vector<1x256xf32>
    %100 = vector.broadcast %99 : vector<1x256xf32> to vector<8x256xf32>
    %101 = arith.mulf %96, %100 : vector<8x256xf32>
    %102 = vector.broadcast %9 : vector<8x1xf32> to vector<8x256xf32>
    %103 = arith.mulf %101, %102 : vector<8x256xf32>
    %104 = vector.broadcast %10 : vector<8x1xf32> to vector<8x256xf32>
    %105 = arith.addf %103, %104 : vector<8x256xf32>
    %cst_31 = arith.constant dense<0.000000e+00> : vector<16x256xf32>
    %106 = tpu.matmul %4, %105, %cst_31 {dimension_numbers = #tpu.dot_dimension_numbers<[1], [0], [0], [1], [0, 0, 1, 1], [], []>} : vector<16x8xf32>, vector<8x256xf32>, vector<16x256xf32> -> vector<16x256xf32>
    %cst_32 = arith.constant dense<0.000000e+00> : vector<16x256xf32>
    %107 = tpu.matmul %5, %58, %cst_32 {dimension_numbers = #tpu.dot_dimension_numbers<[1], [0], [0], [1], [0, 0, 1, 1], [], []>} : vector<16x8xf32>, vector<8x256xf32>, vector<16x256xf32> -> vector<16x256xf32>
    %108 = arith.addf %106, %107 : vector<16x256xf32>
    %cst_33 = arith.constant dense<0.000000e+00> : vector<256xf32>
    %109 = vector.multi_reduction <add>, %108, %cst_33 [0] : vector<16x256xf32> to vector<256xf32>
    %110 = vector.shape_cast %109 : vector<256xf32> to vector<1x256xf32>
    %cst_34 = arith.constant 1.600000e+01 : f32
    %111 = vector.broadcast %cst_34 : f32 to vector<1x256xf32>
    %112 = arith.divf %110, %111 : vector<1x256xf32>
    %113 = arith.mulf %108, %108 : vector<16x256xf32>
    %cst_35 = arith.constant dense<0.000000e+00> : vector<256xf32>
    %114 = vector.multi_reduction <add>, %113, %cst_35 [0] : vector<16x256xf32> to vector<256xf32>
    %115 = vector.shape_cast %114 : vector<256xf32> to vector<1x256xf32>
    %cst_36 = arith.constant 1.600000e+01 : f32
    %116 = vector.broadcast %cst_36 : f32 to vector<1x256xf32>
    %117 = arith.divf %115, %116 : vector<1x256xf32>
    %118 = arith.mulf %112, %112 : vector<1x256xf32>
    %119 = arith.subf %117, %118 : vector<1x256xf32>
    %cst_37 = arith.constant 0.000000e+00 : f32
    %120 = vector.broadcast %cst_37 : f32 to vector<1x256xf32>
    %121 = arith.maximumf %119, %120 : vector<1x256xf32>
    %122 = vector.broadcast %112 : vector<1x256xf32> to vector<16x256xf32>
    %123 = arith.subf %108, %122 : vector<16x256xf32>
    %cst_38 = arith.constant 9.99999974E-6 : f32
    %124 = vector.broadcast %cst_38 : f32 to vector<1x256xf32>
    %125 = arith.addf %121, %124 : vector<1x256xf32>
    %126 = math.rsqrt %125 : vector<1x256xf32>
    %127 = vector.broadcast %126 : vector<1x256xf32> to vector<16x256xf32>
    %128 = arith.mulf %123, %127 : vector<16x256xf32>
    %129 = vector.broadcast %11 : vector<16x1xf32> to vector<16x256xf32>
    %130 = arith.mulf %128, %129 : vector<16x256xf32>
    %131 = vector.broadcast %12 : vector<16x1xf32> to vector<16x256xf32>
    %132 = arith.addf %130, %131 : vector<16x256xf32>
    %cst_39 = arith.constant 0.000000e+00 : f32
    %133 = vector.broadcast %cst_39 : f32 to vector<16x256xf32>
    %134 = arith.maximumf %132, %133 : vector<16x256xf32>
    %135 = arith.addf %134, %14 : vector<16x256xf32>
    %c0_40 = arith.constant 0 : index
    %c0_41 = arith.constant 0 : index
    %c0_42 = arith.constant 0 : index
    %136 = vector.load %arg4[%c0_40, %c0_41, %c0_42] : memref<1x16x256xf32, #tpu.memory_space<vmem>>, vector<1x16x256xf32>
    %137 = vector.shape_cast %136 : vector<1x16x256xf32> to vector<16x256xf32>
    %138 = vector.shape_cast %135 : vector<16x256xf32> to vector<1x16x256xf32>
    tpu.vector_store %arg4[%c0_40, %c0_41, %c0_42], %138 {strides = array<i32>} : memref<1x16x256xf32, #tpu.memory_space<vmem>>, vector<1x16x256xf32>,
    return
  }
  func.func @transform_0(%arg0: i32) -> (i32, i32, i32) {
    %c0_i32 = arith.constant 0 : i32
    %c0_i32_0 = arith.constant 0 : i32
    %c0_i32_1 = arith.constant 0 : i32
    return %arg0, %c0_i32, %c0_i32_0 : i32, i32, i32
  }
  func.func @transform_1(%arg0: i32) -> (i32, i32) {
    %c0_i32 = arith.constant 0 : i32
    %c0_i32_0 = arith.constant 0 : i32
    %c0_i32_1 = arith.constant 0 : i32
    return %c0_i32, %c0_i32_0 : i32, i32
  }
  func.func @transform_2(%arg0: i32) -> (i32, i32) {
    %c0_i32 = arith.constant 0 : i32
    %c0_i32_0 = arith.constant 0 : i32
    %c0_i32_1 = arith.constant 0 : i32
    return %c0_i32, %c0_i32_0 : i32, i32
  }
  func.func @transform_3(%arg0: i32) -> (i32, i32, i32) {
    %c0_i32 = arith.constant 0 : i32
    %c0_i32_0 = arith.constant 0 : i32
    %c0_i32_1 = arith.constant 0 : i32
    return %arg0, %c0_i32, %c0_i32_0 : i32, i32, i32
  }
}

</mosaic_0001>

<bundles_post_ra>
// kernel: tpu_custom_call.1
= control target key start
LH: loop header
LB: loop body
LE: loop exit
PB: predicated region body
PF: predicated region fallthrough
CT: control target
= control target key end

     0   :  { %8 = vsyncpa [#allocation3], 0  ;;  %s1633_s0 = inlined_call_operand.vmem [shape: f32[2,16,256], index: 0, kind: input, shape index: {}]   ;;  %s1634_s1 = inlined_call_operand.vmem [shape: f32[88,16], index: 1, kind: input, shape index: {}]   ;;  %s1635_s2 = inlined_call_operand.vmem [shape: f32[16,6], index: 2, kind: input, shape index: {}]   ;;  %s1636_s3 = inlined_call_operand.hbm [shape: f32[2,16,256], index: 3, kind: output, shape index: {}]  }
   0x1   :  { %10 = vsyncpa [#allocation3 + $0x1], 0  ;;  %s1423_s12 = smov 0   ;;  %s1425_s13 = smov 0  }
   0x2   :  { %s1427_s14 = smov 0   ;;  %s1429_s15 = smov 0  }
   0x3 LB: > { %s1444_s16 = sadd.s32 4294967295, %s1391_s15   ;;  %s1220_s17 = sadd.s32 4294967294, %s1391_s15   ;;  %s1391_s15 = sphi %s1429_s15, %s1642_s15   ;;  %s1387_s14 = sphi %s1427_s14, %s1641_s14   ;;  %s1383_s13 = sphi %s1425_s13, %s1640_s13   ;;  %s1379_s12 = sphi %s1423_s12, %s1639_s12  }
   0x4   : > { %s1448_s18 = sadd.s32 1, %s1391_s15   ;;  %s91_s19 = sadd.s32 1, %s1387_s14 }
   0x5   : > { %s88_s20 = ssub.s32 %s1391_s15, %s1448_s18  ;;  %p101_p0 = scmp.ne.s32.totalorder %s1387_s14, %s1383_s13 }
   0x6   : > { %p89_p1 = scmp.eq.s32.totalorder %s88_s20, 0  ;;  %p102_p2 = scmp.eq.s32.totalorder %s1444_s16, 1 }
   0x7   : > { %p107_p3 = scmp.ne.s32.totalorder %s1383_s13, %s1379_s12  ;;  %p108_p4 = scmp.eq.s32.totalorder %s1220_s17, 1 }
   0x8   : > { %s1459_s21 = scalar_select %p89_p1, %s1387_s14, %s91_s19  }
   0x9   : > { %p1461_p5 = por %p102_p2, %p101_p0  ;;  %p1465_p6 = por %p108_p4, %p107_p3 }
   0xa   : > { %p1223_p7 = scmp.ge.s32.totalorder %s1391_s15, 1  ;;  %p140_p8 = scmp.lt.s32.totalorder %s1391_s15, 3 }
   0xc   : > { %p141_p9 = pnand %p1223_p7, %p140_p8 }
   0xd   : > { %p164_p10 = scmp.lt.s32.totalorder (!%p141_p9), %s1444_s16, 1  ;;  %s161_s10 = sand.u32 (!%p141_p9), 1, %s1383_s13  }
   0xe   : > { %144 = sbr.rel (%p141_p9) target bundleno = 2422 (0x976), region = 32  ;;  %s1224_s11 = sshll.u32 (!%p141_p9), %s161_s10, 5 }
   0xf   : > { %s163_s17 = scalar_lea.vmem (!%p141_p9), [#allocation2], %s1224_s11  ;;  %s1246_s20 = sshll.u32 (!%p141_p9), %s1444_s16, 9 }
  0x10   : > { %s1158_s19 = sshll.u32 (!%p141_p9), %s163_s17, 4  ;;  %s1587_s26 = scalar_lea.hbm (!%p141_p9), %s1636_s3, %s1246_s20  ;;  %s1582_s19 = int_to_ptr.vmem [resolvable:$true] %s1158_s19 }
  0x11   : > { %s1331_s27 = scalar_lea.vmem (!%p141_p9), %s1582_s19, 512 }
  0x12   : > { %p1332_p11 = scmp.ne.s32.totalorder (!%p141_p9), %s1582_s19, %s1331_s27 }
  0x13   : > { %v1393_v0 = vmov 0.0   ;;  %s165_s24 = scalar_select %p164_p10, %s1444_s16, 1  ;;  %v169_v5 = vld [vmem:[%s1634_s1] sm:$0xff]  ;;  %vm186_vm0 = vcmask 130048   ;;  %v170_v6 = vld [vmem:[%s1634_s1 + $0x8] sm:$0xff]  ;;  %v171_v7 = vld [vmem:[%s1634_s1 + $0x10] sm:$0xff] }
  0x14   : > { %266 = vmatprep.mubr.f32.mxu0 %v1393_v0  ;;  %v172_v14 = vld [vmem:[%s1634_s1 + $0x18] sm:$0xff]  ;;  %vm367_vm1 = vcmask 64512   ;;  %v173_v28 = vld [vmem:[%s1634_s1 + $0x20] sm:$0xff]  ;;  %v1394_v30 = vmov 0   ;;  %v1395_v31 = vmov 1   ;;  %v174_v34 = vld [vmem:[%s1634_s1 + $0x28] sm:$0xff]  ;;  %p1333_p12 = pnand %p1332_p11, %p1461_p5 }
  0x15   : > { %s1245_s25 = sshll.u32 %s165_s24, 5  ;;  %v1524_v29 = vld [vmem:[%s1635_s2] sm:$0xff]  ;;  %1295 = vset.pattern.permute.xlu1 %v1394_v30  ;;  %s1593_s16 = scalar_lea.sflag [#allocation3], %s161_s10 }
  0x16   : > { %s168_s28 = scalar_lea.vmem %s1633_s0, %s1245_s25  ;;  %576 = vperm.xlu1 %1295, %v1524_v29   ;;  %p1334_p13 = pneg %p1333_p12 }
  0x17   : > { %v1477_v1 = vld [vmem:[%s168_s28 + $0x18] sm:$0xff]  ;;  %v1479_v2 = vld [vmem:[%s168_s28 + $0x10] sm:$0xff]  ;;  %v1481_v3 = vld [vmem:[%s168_s28 + $0x8] sm:$0xff] }
  0x18   : > { %230 = vmatprep.subr.mxu0 %v1477_v1  ;;  %v1484_v4 = vld [vmem:[%s168_s28] sm:$0xff]  ;;  %s1400_s28 = smov [#allocation2]  }
  0x19   : > { %231 = vmatpush1.msra.mxu0 %v1479_v2  ;;  %s1335_s29 = sshll.u32 %s1400_s28, 4  ;;  %s1336_s29 = int_to_ptr.vmem [resolvable:$false] %s1335_s29 }
  0x1a   : > { %232 = vmatprep.subr.mxu0 %v1481_v3  ;;  %1296 = vset.pattern.permute.xlu1 %v1395_v31  ;;  %s1337_s30 = scalar_lea.vmem %s1336_s29, 1024  ;;  %p1338_p0 = scmp.lt.s32.totalorder %s1582_s19, %s1336_s29 }
  0x1b   : > { %233 = vmatpush1.msra.mxu0 %v1484_v4  ;;  %582 = vperm.xlu1 %1296, %v1524_v29   ;;  %p1339_p1 = scmp.lt.s32.totalorder %s1337_s30, %s1331_s27 }
  0x1c   : > { %1227 = vmatmul.mubr.msk.f32.vlgmr.msra.gmra.mxu0 %vm186_vm0, %v169_v5 }
  0x1d   : > { %272 = vmatprep.mubr.f32.mxu0 %v1393_v0  ;;  %p1340_p2 = por %p1339_p1, %p1338_p0 }
  0x1f   : > { %p1341_p3 = pnand %p1340_p2, %p1334_p13 }
  0x20   : > { %1228 = vmatmul.mubr.msk.f32.gmra.mxu0 %vm186_vm0, %v170_v6 }
  0x21   : > { %278 = vmatprep.mubr.f32.mxu0 %v1393_v0 }
  0x24   : > { %1229 = vmatmul.mubr.msk.f32.gmra.mxu0 %vm186_vm0, %v171_v7 }
  0x25   : > { %284 = vmatprep.mubr.f32.mxu0 %v1393_v0 }
  0x28   : > { %1230 = vmatmul.mubr.msk.f32.gmra.mxu0 %vm186_vm0, %v172_v14 }
  0x29   : > { %290 = vmatprep.mubr.f32.mxu0 %v1393_v0 }
  0x2c   : > { %1231 = vmatmul.mubr.msk.f32.gmra.mxu0 %vm186_vm0, %v173_v28 }
  0x2d   : > { %823 = vmatprep.mubr.f32.mxu0 %v1393_v0 }
  0xdc   : > { %v1504_v8 = vpop.f32.mrf.mxu0 }
  0xde   : > { %v270_v9 = vpop.f32.mrf.mxu0 }
  0xe0   : > { %v274_v10 = vpop.f32.mrf.mxu0 }
  0xe2   : > { %v276_v11 = vpop.f32.mrf.mxu0 }
  0xe3   : > { %361 = vmatprep.mubr.f32.mxu1 %v276_v11 }
  0xe4   : > { %v280_v12 = vpop.f32.mrf.mxu0 }
  0xe6   : > { %v282_v13 = vpop.f32.mrf.mxu0 }
  0xe7   : > { %327 = vmatprep.subr.mxu1 %v282_v13 }
  0xe8   : > { %328 = vmatpush1.xpose.msra.mxu1 %v280_v12  ;;  %v286_v23 = vpop.f32.mrf.mxu0 }
  0xea   : > { %v288_v24 = vpop.f32.mrf.mxu0 }
  0xeb   : > { %362 = vmatmul.mubr.f32.vlgmr.msra.gmra.mxu1 %v274_v10  ;;  %412 = vmatprep.subr.mxu1 %v288_v24 }
  0xec   : > { %446 = vmatprep.mubr.f32.mxu1 %v1393_v0  ;;  %413 = vmatpush1.msra.mxu1 %v286_v23  ;;  %v292_v35 = vpop.f32.mrf.mxu0 }
  0xee   : > { %v294_v38 = vpop.f32.mrf.mxu0 }
 0x1ab   : > { %v363_v15 = vpop.f32.mrf.mxu1 }
 0x1ac   : > { %v368_v16 = vsel %vm367_vm1, %v363_v15, -inf }
 0x1ad   : > { %369 = vmax.xlane.f32.xlu0 %v368_v16  ;;  %v365_v17 = vpop.f32.mrf.mxu1 }
 0x236   : > { %v370_v18 = vpop.xlane.xlu0 %369 }
 0x237   : > { %v371_v19 = vsub.f32 %v363_v15, %v370_v18 }
 0x239   : > { %v372_v20 = vmul.f32 1.442695, %v371_v19 }
 0x23b   : > { %1303 = vpow2.f32 %v372_v20 }
 0x248   : > { %v1304_v21 = vpop.eup %1303 }
 0x249   : > { %v374_v22 = vsel %vm367_vm1, %v1304_v21, 0.0 }
 0x24a   : > { %375 = vadd.xlane.f32.xlu0 %v374_v22 }
 0x2d3   : > { %v376_v25 = vpop.xlane.xlu0 %375 }
 0x2d4   : > { %1305 = vrcp.f32 %v376_v25 }
 0x2e1   : > { %v1306_v26 = vpop.eup %1305 }
 0x2e2   : > { %v378_v27 = vmul.f32 %v1306_v26, %v1304_v21  ;;  %v577_v21 = vpop.permute.xlu1 %576 }
 0x2e4   : > { %1232 = vmatmul.mubr.msk.f32.vlgmr.msra.gmra.mxu1 %vm367_vm1, %v378_v27 }
 0x2e5   : > { %520 = vmatprep.mubr.f32.mxu1 %v1393_v0 }
 0x2e6   : > { %v583_v31 = vpop.permute.xlu1 %582 }
 0x3a4   : > { %v448_v32 = vpop.f32.mrf.mxu1 }
 0x3a6   : > { %v450_v33 = vpop.f32.mrf.mxu1 }
 0x3a7   : > { %486 = vmatprep.subr.mxu1 %v450_v33 }
 0x3a8   : > { %487 = vmatpush1.msra.mxu1 %v448_v32 }
 0x3a9   : > { %1233 = vmatmul.mubr.msk.f32.vlgmr.msra.gmra.mxu1 %vm367_vm1, %v174_v34 }
 0x3aa   : > { %651 = vmatprep.mubr.f32.mxu1 %v270_v9 }
 0x469   : > { %v522_v36 = vpop.f32.mrf.mxu1 }
 0x46a   : > { %v527_v37 = vadd.f32 %v522_v36, %v292_v35 }
 0x46b   : > { %v524_v39 = vpop.f32.mrf.mxu1 }
 0x46c   : > { %v529_v40 = vrot.slane %v527_v37, 4  ;;  %v544_v41 = vmul.f32 %v527_v37, %v527_v37  ;;  %v528_v42 = vadd.f32 %v524_v39, %v294_v38 }
 0x46e   : > { %v530_v43 = vadd.f32 %v529_v40, %v527_v37  ;;  %v546_v44 = vrot.slane %v544_v41, 4  ;;  %v535_v45 = vrot.slane %v528_v42, 4  ;;  %v545_v46 = vmul.f32 %v528_v42, %v528_v42 }
 0x470   : > { %v531_v47 = vrot.slane %v530_v43, 2  ;;  %v547_v48 = vadd.f32 %v546_v44, %v544_v41  ;;  %v536_v49 = vadd.f32 %v535_v45, %v528_v42  ;;  %v552_v50 = vrot.slane %v545_v46, 4 }
 0x471   : > { %v1396_v44 = vmov 2   ;;  %v1397_v45 = vmov 3  }
 0x472   : > { %v548_v51 = vrot.slane %v547_v48, 2  ;;  %v537_v52 = vrot.slane %v536_v49, 2  ;;  %v553_v53 = vadd.f32 %v552_v50, %v545_v46  ;;  %v532_v54 = vadd.f32 %v531_v47, %v530_v43  ;;  %1297 = vset.pattern.permute.xlu0 %v1396_v44  ;;  %1298 = vset.pattern.permute.xlu1 %v1397_v45 }
 0x474   : > { %v549_v55 = vadd.f32 %v548_v51, %v547_v48  ;;  %v554_v56 = vrot.slane %v553_v53, 2  ;;  %v533_v57 = vrot.slane %v532_v54, 1  ;;  %v538_v58 = vadd.f32 %v537_v52, %v536_v49 }
 0x476   : > { %v550_v59 = vrot.slane %v549_v55, 1  ;;  %v555_v60 = vadd.f32 %v554_v56, %v553_v53  ;;  %v534_v61 = vadd.f32 %v533_v57, %v532_v54  ;;  %v539_v62 = vrot.slane %v538_v58, 1 }
 0x478   : > { %v556_v63 = vrot.slane %v555_v60, 1  ;;  %v540_v5 = vadd.f32 %v539_v62, %v538_v58  ;;  %v542_v6 = vmul.f32 0.125, %v534_v61  ;;  %v551_v7 = vadd.f32 %v550_v59, %v549_v55  ;;  %v175_v62 = vld [vmem:[%s1634_s1 + $0x30] sm:$0xff] }
 0x47a   : > { %v543_v9 = vmul.f32 0.125, %v540_v5  ;;  %v557_v10 = vadd.f32 %v556_v63, %v555_v60  ;;  %v558_v11 = vmul.f32 0.125, %v551_v7  ;;  %v560_v12 = vmul.f32 %v542_v6, %v542_v6  ;;  %v178_v63 = vld [vmem:[%s1634_s1 + $0x48] sm:$0xff]  ;;  %v179_v5 = vld [vmem:[%s1634_s1 + $0x50] sm:$0xff] }
 0x47b   : > { %v566_v22 = vsub.f32 %v527_v37, %v542_v6  ;;  %v181_v6 = vld [vmem:[%s1635_s2 + $0x8] sm:$0xff]  ;;  %v1398_v7 = vmov 4  }
 0x47c   : > { %v559_v13 = vmul.f32 0.125, %v557_v10  ;;  %v561_v14 = vmul.f32 %v543_v9, %v543_v9  ;;  %v562_v15 = vsub.f32 %v558_v11, %v560_v12  ;;  %v567_v24 = vsub.f32 %v528_v42, %v543_v9 }
 0x47d   : > { %v1399_v9 = vmov 5  }
 0x47e   : > { %v563_v16 = vsub.f32 %v559_v13, %v561_v14  ;;  %v564_v17 = vmax.f32 %v562_v15, 0.0 }
 0x480   : > { %v565_v18 = vmax.f32 %v563_v16, 0.0  ;;  %v568_v19 = vadd.f32 1e-05, %v564_v17 }
 0x482   : > { %v569_v20 = vadd.f32 1e-05, %v565_v18  ;;  %1307 = vrsqrt.f32 %v568_v19 }
 0x484   : > { %1309 = vrsqrt.f32 %v569_v20 }
 0x48f   : > { %v1308_v23 = vpop.eup %1307 }
 0x490   : > { %v572_v25 = vmul.f32 %v1308_v23, %v566_v22 }
 0x491   : > { %v1310_v26 = vpop.eup %1309 }
 0x492   : > { %v573_v27 = vmul.f32 %v1310_v26, %v567_v24  ;;  %v579_v28 = vmul.f32 %v577_v21, %v572_v25 }
 0x494   : > { %v580_v30 = vmul.f32 %v577_v21, %v573_v27  ;;  %v585_v33 = vadd.f32 %v583_v31, %v579_v28 }
 0x496   : > { %v586_v32 = vadd.f32 %v583_v31, %v580_v30 }
 0x498   : > { %617 = vmatprep.subr.mxu1 %v586_v32 }
 0x499   : > { %618 = vmatpush1.xpose.msra.mxu1 %v585_v33 }
 0x49a   : > { %701 = vmatprep.subr.mxu1 %v586_v32 }
 0x49c   : > { %652 = vmatmul.mubr.f32.vlgmr.msra.gmra.mxu1 %v1504_v8 }
 0x49d   : > { %702 = vmatpush1.msra.mxu1 %v585_v33  ;;  %735 = vmatprep.mubr.f32.mxu1 %v1393_v0 }
 0x49e   : > { %922 = vmatprep.subr.mxu1 %v586_v32 }
 0x55c   : > { %v653_v34 = vpop.f32.mrf.mxu1 }
 0x55d   : > { %v657_v35 = vsel %vm367_vm1, %v653_v34, -inf }
 0x55e   : > { %658 = vmax.xlane.f32.xlu0 %v657_v35  ;;  %v655_v36 = vpop.f32.mrf.mxu1 }
 0x574   : > { %875 = vperm.xlu0 %1297, %v1524_v29  }
 0x578   : > { %1299 = vset.pattern.permute.xlu0 %v1398_v7 }
 0x579   : > { %1108 = vperm.xlu0 %1299, %v1524_v29  }
 0x57d   : > { %1301 = vset.pattern.permute.xlu0 %v1399_v9 }
 0x57e   : > { %1121 = vperm.xlu0 %1301, %v1524_v29  }
 0x5e7   : > { %v659_v37 = vpop.xlane.xlu0 %658 }
 0x5e8   : > { %v660_v38 = vsub.f32 %v653_v34, %v659_v37 }
 0x5ea   : > { %v661_v39 = vmul.f32 1.442695, %v660_v38 }
 0x5ec   : > { %1311 = vpow2.f32 %v661_v39 }
 0x5f9   : > { %v1312_v40 = vpop.eup %1311 }
 0x5fa   : > { %v663_v41 = vsel %vm367_vm1, %v1312_v40, 0.0 }
 0x5fb   : > { %664 = vadd.xlane.f32.xlu1 %v663_v41 }
 0x60c   : > { %881 = vperm.xlu1 %1298, %v1524_v29  }
 0x610   : > { %1300 = vset.pattern.permute.xlu1 %v1398_v7 }
 0x611   : > { %1113 = vperm.xlu1 %1300, %v181_v6  }
 0x615   : > { %1302 = vset.pattern.permute.xlu1 %v1399_v9 }
 0x616   : > { %1125 = vperm.xlu1 %1302, %v181_v6  }
 0x684   : > { %v665_v42 = vpop.xlane.xlu1 %664 }
 0x685   : > { %1313 = vrcp.f32 %v665_v42 }
 0x692   : > { %v1314_v8 = vpop.eup %1313 }
 0x693   : > { %v667_v43 = vmul.f32 %v1314_v8, %v1312_v40 }
 0x695   : > { %1234 = vmatmul.mubr.msk.f32.vlgmr.msra.gmra.mxu1 %vm367_vm1, %v667_v43 }
 0x696   : > { %923 = vmatpush1.msra.mxu1 %v585_v33  ;;  %956 = vmatprep.mubr.f32.mxu1 %v1393_v0 }
 0x699   : > { %1236 = vmatmul.mubr.msk.f32.vlgmr.msra.gmra.mxu1 %vm367_vm1, %v178_v63 }
 0x69a   : > { %962 = vmatprep.mubr.f32.mxu1 %v1393_v0 }
 0x69d   : > { %1237 = vmatmul.mubr.msk.f32.gmra.mxu1 %vm367_vm1, %v179_v5 }
 0x755   : > { %v737_v46 = vpop.f32.mrf.mxu1 }
 0x756   : > { %v742_v47 = vsub.f32 0.0, %v737_v46 }
 0x757   : > { %v739_v48 = vpop.f32.mrf.mxu1 }
 0x758   : > { %v744_v49 = vmul.f32 1.442695, %v742_v47  ;;  %v743_v50 = vsub.f32 0.0, %v739_v48 }
 0x759   : > { %v958_v63 = vpop.f32.mrf.mxu1 }
 0x75a   : > { %1315 = vpow2.f32 %v744_v49  ;;  %v746_v51 = vmul.f32 1.442695, %v743_v50 }
 0x75b   : > { %v960_v5 = vpop.f32.mrf.mxu1 }
 0x75c   : > { %1317 = vpow2.f32 %v746_v51  ;;  %v876_v51 = vpop.permute.xlu0 %875 }
 0x75d   : > { %v964_v9 = vpop.f32.mrf.mxu1 }
 0x767   : > { %v1316_v52 = vpop.eup %1315 }
 0x768   : > { %v748_v53 = vadd.f32 1.0, %v1316_v52 }
 0x769   : > { %v1318_v54 = vpop.eup %1317 }
 0x76a   : > { %1319 = vrcp.f32 %v748_v53  ;;  %v749_v55 = vadd.f32 1.0, %v1318_v54 }
 0x76c   : > { %1321 = vrcp.f32 %v749_v55 }
 0x777   : > { %v1320_v56 = vpop.eup %1319 }
 0x778   : > { %v752_v58 = vadd.f32 1.0, %v1320_v56 }
 0x779   : > { %v1322_v57 = vpop.eup %1321 }
 0x77a   : > { %v753_v59 = vadd.f32 1.0, %v1322_v57  ;;  %v754_v61 = vmul.f32 %v752_v58, %v1484_v4  ;;  %v882_v58 = vpop.permute.xlu1 %881 }
 0x77c   : > { %v755_v60 = vmul.f32 %v753_v59, %v1481_v3 }
 0x77e   : > { %789 = vmatprep.subr.mxu0 %v755_v60 }
 0x77f   : > { %790 = vmatpush1.msra.mxu0 %v754_v61  ;;  %v176_v61 = vld [vmem:[%s1634_s1 + $0x38] sm:$0xff] }
 0x780   : > { %1235 = vmatmul.mubr.msk.f32.vlgmr.msra.gmra.mxu0 %vm367_vm1, %v175_v62  ;;  %v177_v62 = vld [vmem:[%s1634_s1 + $0x40] sm:$0xff] }
 0x781   : > { %1039 = vmatprep.mubr.f32.mxu0 %v1393_v0 }
 0x840   : > { %v825_v10 = vpop.f32.mrf.mxu0 }
 0x841   : > { %v830_v11 = vrot.slane %v825_v10, 4  ;;  %v844_v12 = vmul.f32 %v825_v10, %v825_v10 }
 0x842   : > { %v827_v13 = vpop.f32.mrf.mxu0 }
 0x843   : > { %v831_v14 = vadd.f32 %v830_v11, %v825_v10  ;;  %v846_v15 = vrot.slane %v844_v12, 4  ;;  %v836_v16 = vrot.slane %v827_v13, 4  ;;  %v845_v17 = vmul.f32 %v827_v13, %v827_v13 }
 0x845   : > { %v832_v18 = vrot.slane %v831_v14, 2  ;;  %v847_v19 = vadd.f32 %v846_v15, %v844_v12  ;;  %v837_v20 = vadd.f32 %v836_v16, %v827_v13  ;;  %v852_v21 = vrot.slane %v845_v17, 4 }
 0x847   : > { %v833_v22 = vadd.f32 %v832_v18, %v831_v14  ;;  %v848_v23 = vrot.slane %v847_v19, 2  ;;  %v838_v24 = vrot.slane %v837_v20, 2  ;;  %v853_v25 = vadd.f32 %v852_v21, %v845_v17  ;;  %v966_v14 = vpop.f32.mrf.mxu1 }
 0x849   : > { %v834_v26 = vrot.slane %v833_v22, 1  ;;  %v849_v27 = vadd.f32 %v848_v23, %v847_v19  ;;  %v839_v29 = vadd.f32 %v838_v24, %v837_v20  ;;  %v854_v28 = vrot.slane %v853_v25, 2 }
 0x84b   : > { %v850_v30 = vrot.slane %v849_v27, 1  ;;  %v840_v31 = vrot.slane %v839_v29, 1  ;;  %v855_v32 = vadd.f32 %v854_v28, %v853_v25  ;;  %v835_v33 = vadd.f32 %v834_v26, %v833_v22 }
 0x84d   : > { %v851_v34 = vadd.f32 %v850_v30, %v849_v27  ;;  %v856_v35 = vrot.slane %v855_v32, 1  ;;  %v841_v36 = vadd.f32 %v840_v31, %v839_v29  ;;  %v842_v37 = vmul.f32 0.125, %v835_v33 }
 0x84f   : > { %v858_v38 = vmul.f32 0.125, %v851_v34  ;;  %v857_v39 = vadd.f32 %v856_v35, %v855_v32  ;;  %v843_v40 = vmul.f32 0.125, %v841_v36  ;;  %v860_v41 = vmul.f32 %v842_v37, %v842_v37 }
 0x850   : > { %v866_v49 = vsub.f32 %v825_v10, %v842_v37 }
 0x851   : > { %v859_v42 = vmul.f32 0.125, %v857_v39  ;;  %v861_v8 = vmul.f32 %v843_v40, %v843_v40  ;;  %v862_v43 = vsub.f32 %v858_v38, %v860_v41  ;;  %v867_v52 = vsub.f32 %v827_v13, %v843_v40 }
 0x853   : > { %v863_v44 = vsub.f32 %v859_v42, %v861_v8  ;;  %v864_v45 = vmax.f32 %v862_v43, 0.0 }
 0x855   : > { %v865_v46 = vmax.f32 %v863_v44, 0.0  ;;  %v868_v47 = vadd.f32 1e-05, %v864_v45 }
 0x857   : > { %v869_v48 = vadd.f32 1e-05, %v865_v46  ;;  %1323 = vrsqrt.f32 %v868_v47 }
 0x859   : > { %1325 = vrsqrt.f32 %v869_v48 }
 0x864   : > { %v1324_v50 = vpop.eup %1323 }
 0x865   : > { %v872_v53 = vmul.f32 %v1324_v50, %v866_v49 }
 0x866   : > { %v1326_v54 = vpop.eup %1325 }
 0x867   : > { %v873_v55 = vmul.f32 %v1326_v54, %v867_v52  ;;  %v878_v56 = vmul.f32 %v876_v51, %v872_v53 }
 0x869   : > { %v879_v57 = vmul.f32 %v876_v51, %v873_v55  ;;  %v884_v60 = vadd.f32 %v882_v58, %v878_v56 }
 0x86b   : > { %v885_v59 = vadd.f32 %v882_v58, %v879_v57 }
 0x86d   : > { %1005 = vmatprep.subr.mxu0 %v885_v59  ;;  %v1114_v59 = vpop.permute.xlu1 %1113 }
 0x86e   : > { %1006 = vmatpush1.msra.mxu0 %v884_v60  ;;  %v1109_v60 = vpop.permute.xlu0 %1108 }
 0x86f   : > { %1238 = vmatmul.mubr.msk.f32.vlgmr.msra.gmra.mxu0 %vm367_vm1, %v176_v61 }
 0x870   : > { %1045 = vmatprep.mubr.f32.mxu0 %v1393_v0 }
 0x873   : > { %1239 = vmatmul.mubr.msk.f32.gmra.mxu0 %vm367_vm1, %v177_v62 }
 0x92f   : > { %v1041_v6 = vpop.f32.mrf.mxu0 }
 0x930   : > { %v1042_v10 = vadd.f32 %v1041_v6, %v958_v63 }
 0x931   : > { %v1043_v7 = vpop.f32.mrf.mxu0 }
 0x932   : > { %v1570_v11 = vadd.f32 %v1043_v7, %v960_v5  ;;  %v1069_v16 = vmul.f32 %v1042_v10, %v1042_v10 }
 0x933   : > { %v1047_v12 = vpop.f32.mrf.mxu0 }
 0x934   : > { %v1048_v13 = vadd.f32 %v1047_v12, %v964_v9  ;;  %v1070_v19 = vmul.f32 %v1570_v11, %v1570_v11  ;;  %v1126_v12 = vpop.permute.xlu1 %1125 }
 0x935   : > { %v1049_v15 = vpop.f32.mrf.mxu0 }
 0x936   : > { %v1052_v0 = vadd.f32 %v1048_v13, %v1042_v10  ;;  %v1071_v17 = vmul.f32 %v1048_v13, %v1048_v13  ;;  %v1050_v18 = vadd.f32 %v1049_v15, %v966_v14  ;;  %v1122_v14 = vpop.permute.xlu0 %1121 }
 0x938   : > { %v1053_v20 = vrot.slane %v1052_v0, 4  ;;  %v1073_v21 = vadd.f32 %v1071_v17, %v1069_v16  ;;  %v1059_v22 = vadd.f32 %v1050_v18, %v1570_v11  ;;  %v1072_v23 = vmul.f32 %v1050_v18, %v1050_v18 }
 0x93a   : > { %v1054_v24 = vadd.f32 %v1053_v20, %v1052_v0  ;;  %v1074_v25 = vrot.slane %v1073_v21, 4  ;;  %v1060_v26 = vrot.slane %v1059_v22, 4  ;;  %v1080_v27 = vadd.f32 %v1072_v23, %v1070_v19 }
 0x93c   : > { %v1055_v29 = vrot.slane %v1054_v24, 2  ;;  %v1075_v28 = vadd.f32 %v1074_v25, %v1073_v21  ;;  %v1061_v30 = vadd.f32 %v1060_v26, %v1059_v22  ;;  %v1081_v31 = vrot.slane %v1080_v27, 4 }
 0x93e   : > { %v1056_v32 = vadd.f32 %v1055_v29, %v1054_v24  ;;  %v1076_v33 = vrot.slane %v1075_v28, 2  ;;  %v1062_v34 = vrot.slane %v1061_v30, 2  ;;  %v1082_v35 = vadd.f32 %v1081_v31, %v1080_v27 }
 0x940   : > { %v1057_v36 = vrot.slane %v1056_v32, 1  ;;  %v1077_v37 = vadd.f32 %v1076_v33, %v1075_v28  ;;  %v1063_v38 = vadd.f32 %v1062_v34, %v1061_v30  ;;  %v1083_v39 = vrot.slane %v1082_v35, 2 }
 0x942   : > { %v1058_v40 = vadd.f32 %v1057_v36, %v1056_v32  ;;  %v1078_v41 = vrot.slane %v1077_v37, 1  ;;  %v1064_v42 = vrot.slane %v1063_v38, 1  ;;  %v1084_v8 = vadd.f32 %v1083_v39, %v1082_v35 }
 0x944   : > { %v1067_v43 = vmul.f32 0.0625, %v1058_v40  ;;  %v1079_v44 = vadd.f32 %v1078_v41, %v1077_v37  ;;  %v1065_v45 = vadd.f32 %v1064_v42, %v1063_v38  ;;  %v1085_v46 = vrot.slane %v1084_v8, 1 }
 0x946   : > { %v1087_v47 = vmul.f32 0.0625, %v1079_v44  ;;  %v1089_v48 = vmul.f32 %v1067_v43, %v1067_v43  ;;  %v1068_v49 = vmul.f32 0.0625, %v1065_v45  ;;  %v1086_v50 = vadd.f32 %v1085_v46, %v1084_v8 }
 0x947   : > { %v1097_v61 = vsub.f32 %v1048_v13, %v1067_v43  ;;  %v1095_v62 = vsub.f32 %v1042_v10, %v1067_v43 }
 0x948   : > { %v1091_v51 = vsub.f32 %v1087_v47, %v1089_v48  ;;  %v1090_v52 = vmul.f32 %v1068_v49, %v1068_v49  ;;  %v1088_v53 = vmul.f32 0.0625, %v1086_v50  ;;  %v1098_v7 = vsub.f32 %v1050_v18, %v1068_v49 }
 0x949   : > { %v1096_v9 = vsub.f32 %v1570_v11, %v1068_v49 }
 0x94a   : > { %v1093_v54 = vmax.f32 %v1091_v51, 0.0  ;;  %v1092_v55 = vsub.f32 %v1088_v53, %v1090_v52 }
 0x94c   : > { %v1099_v56 = vadd.f32 1e-05, %v1093_v54  ;;  %v1094_v57 = vmax.f32 %v1092_v55, 0.0 }
 0x94e   : > { %1327 = vrsqrt.f32 %v1099_v56  ;;  %v1100_v58 = vadd.f32 1e-05, %v1094_v57 }
 0x950   : > { %1329 = vrsqrt.f32 %v1100_v58 }
 0x95b   : > { %v1328_v63 = vpop.eup %1327 }
 0x95c   : > { %v1105_v5 = vmul.f32 %v1328_v63, %v1097_v61  ;;  %v1103_v6 = vmul.f32 %v1328_v63, %v1095_v62 }
 0x95d   : > { %v1330_v15 = vpop.eup %1329 }
 0x95e   : > { %v1118_v16 = vmul.f32 %v1114_v59, %v1105_v5  ;;  %v1116_v0 = vmul.f32 %v1109_v60, %v1103_v6  ;;  %v1106_v17 = vmul.f32 %v1330_v15, %v1098_v7  ;;  %v1104_v19 = vmul.f32 %v1330_v15, %v1096_v9 }
 0x960   : > { %v1130_v20 = vadd.f32 %v1126_v12, %v1118_v16  ;;  %v1128_v13 = vadd.f32 %v1122_v14, %v1116_v0  ;;  %v1119_v10 = vmul.f32 %v1114_v59, %v1106_v17  ;;  %v1117_v21 = vmul.f32 %v1109_v60, %v1104_v19 }
 0x962   : > { %v1134_v22 = vmax.f32 %v1130_v20, 0.0  ;;  %v1132_v23 = vmax.f32 %v1128_v13, 0.0  ;;  %v1131_v24 = vadd.f32 %v1126_v12, %v1119_v10  ;;  %v1129_v11 = vadd.f32 %v1122_v14, %v1117_v21 }
 0x964   : > { %v1138_v18 = vadd.f32 %v1134_v22, %v1479_v2  ;;  %v1136_v25 = vadd.f32 %v1132_v23, %v1484_v4  ;;  %v1135_v26 = vmax.f32 %v1131_v24, 0.0  ;;  %v1133_v27 = vmax.f32 %v1129_v11, 0.0 }
 0x966   : > { %1142 = vst [vmem:[%s163_s17 + $0x10] sm:$0xff] %v1138_v18  ;;  %1140 = vst [vmem:[%s163_s17] sm:$0xff] %v1136_v25  ;;  %v1139_v29 = vadd.f32 %v1135_v26, %v1477_v1  ;;  %v1137_v2 = vadd.f32 %v1133_v27, %v1481_v3 }
 0x968   : > { %1143 = vst [vmem:[%s163_s17 + $0x18] sm:$0xff] %v1139_v29  ;;  %1141 = vst [vmem:[%s163_s17 + $0x8] sm:$0xff] %v1137_v2 }
 0x969   : > { %1344 = shalt.err (!%p1341_p3)
}
 0x96a   : > { %s1345_s4 = scalar_lea.hbm %s1587_s26, 512  ;;  %s1349_s7 = scalar_lea.hbm %s1636_s3, 1024 }
 0x96b   : > { %p1346_p4 = scmp.ne.s32.totalorder %s1587_s26, %s1345_s4  ;;  %p1350_p9 = scmp.lt.s32.totalorder %s1587_s26, %s1636_s3 }
 0x96c   : > { %p1351_p10 = scmp.lt.s32.totalorder %s1349_s7, %s1345_s4 }
 0x96d   : > { %p1347_p7 = pnand %p1346_p4, %p1461_p5 }
 0x96e   : > { %p1352_p11 = por %p1351_p10, %p1350_p9 }
 0x96f   : > { %p1348_p8 = pneg %p1347_p7 }
 0x971   : > { %p1353_p12 = pnand %p1352_p11, %p1348_p8 }
 0x973   : > { %1356 = shalt.err (!%p1353_p12)
}
 0x974   : > { %s1401_s10 = smov 256   ;;  %s1402_s11 = smov 16  }
 0x975   : > { %1247 = dma.vmem_to_hbm [thread:$0]  (%p1461_p5), %s1582_s19, 512, %s1587_s26, %s1593_s16, %s1401_s10, %s1401_s10, %s1402_s11  }
 0x976 PF: > { %p1253_p13 = scmp.ge.s32.totalorder %s1391_s15, 2  ;;  %s1173_s17 = sand.u32 1, %s1379_s12  }
 0x977   : > { %s1174_s20 = scalar_lea.sflag [#allocation3], %s1173_s17 }
 0x978   : > { %p1250_p0 = pnand %p1253_p13, %p1465_p6 }
 0x97a   : > { %p1251_p1 = pneg %p1250_p0 }
 0x97c   : > { %1374 = dma.done.wait (%p1251_p1), %s1174_s20, 512  }
 0x97d   : > { %1376 = vsyncadd (%p1251_p1), %s1174_s20, 4294966784  ;;  %p13_p2 = scmp.ge.s32.totalorder %s1448_s18, 4   ;;  %s1639_s12 = smov %s1383_s13 }
 0x97e   : > { %s1640_s13 = smov %s1387_s14  ;;  %s1641_s14 = smov %s1459_s21 }
 0x97f   : > { %s1642_s15 = smov %s1448_s18  ;;  %15 = sbr.rel (!%p13_p2) target bundleno = 3 (0x3), region = 67 }
 0x984   :  { %1179 = vsyncpa [#allocation3], 1 }
 0x985   :  { %1181 = vsyncpa [#allocation3 + $0x1], 1 }

</bundles_post_ra>
